<compile_context>
chip_gen: v7x
topology: tpu7x:2x2x1
jax: 0.10.0
libtpu: 0.0.40
codegen_flags: <defaults>
</compile_context>

<pallas_src>
import functools

import jax
import jax.numpy as jnp
from jax.experimental import pallas as pl
from jax.experimental.pallas import tpu as pltpu

# ---- BertConfig values implied by the module --------------------------------
HIDDEN = 768          # config.hidden_size
MAX_POS = 13          # config.max_position_embeddings
TYPE_VOCAB = 2        # BertConfig default type_vocab_size
LN_EPS = 1e-12        # BertConfig default layer_norm_eps
PAD_TOKEN_ID = 0      # BertConfig default pad_token_id

# ---- demo problem size -------------------------------------------------------
B = 2
S = 13                # sequence length (<= max_position_embeddings)
VOCAB = 64            # `vocabulary_size` ctor arg (small demo value)

K_PAD = 128           # fused-table rows, padded to the MXU contraction width
SUBLANE = 8           # row-padding granularity


def bert_embeddings_kernel(ids_ref, tab_ref, gamma_ref, beta_ref, o_ref,
                           *, seq_len, vocab):
    """Gridless single invocation; all refs are full-array VMEM blocks.

    ids_ref   : (N_pad, 1) int32   word ids (row-major over (B, S), padded)
    tab_ref   : (K_PAD, H) f32     fused [word_tab ; pos_tab + tt_tab[0] ; 0pad]
    gamma_ref : (1, H) f32         LayerNorm weight
    beta_ref  : (1, H) f32         LayerNorm bias
    o_ref     : (N_pad, H) f32
    """
    n, _ = o_ref.shape
    k = tab_ref.shape[0]

    word_ids = ids_ref[...]                                        # (N, 1)
    # Default-path position ids generated in-kernel: row i -> i % S, offset by
    # VOCAB into the fused table (token_type_ids == 0 folded into those rows).
    row_ids = jax.lax.broadcasted_iota(jnp.int32, (n, 1), 0)       # (N, 1)
    pos_cols = row_ids % seq_len + vocab                           # (N, 1)

    # Single multi-hot (N, K_PAD): word column and position column never
    # collide (word < VOCAB <= pos), so OR == sum of two one-hot rows.
    cols = jax.lax.broadcasted_iota(jnp.int32, (n, k), 1)          # (N, K)
    multihot = ((cols == word_ids) | (cols == pos_cols)).astype(jnp.float32)

    # One MXU matmul = word_emb + pos_emb + tt_emb[0] in a single pass.
    emb = jnp.dot(multihot, tab_ref[...],
                  preferred_element_type=jnp.float32)              # (N, H)

    # LayerNorm over the hidden axis (biased variance, matches nn.LayerNorm).
    mu = jnp.mean(emb, axis=-1, keepdims=True)
    emb = emb - mu                                # overwrite: one fewer temp
    var = jnp.mean(emb * emb, axis=-1, keepdims=True)
    inv = jax.lax.rsqrt(var + LN_EPS)             # EUP rsqrt, no VALU divide
    y = emb * (inv * gamma_ref[...]) + beta_ref[...]

    # hidden_dropout_prob dropout == identity in eval mode.
    o_ref[...] = y.astype(o_ref.dtype)


def prepare_embedding_params(word_tab, pos_tab, tt_tab, gamma, beta):
    """One-time (model-load) prep: fused, K_PAD-padded table + 2-D LN params.

    Default path (token_type_ids is None): every token receives exactly
    tt_tab[0], so it is folded into the position rows.
    """
    vocab, h = word_tab.shape
    max_pos = pos_tab.shape[0]
    assert vocab + max_pos <= K_PAD, "fused table exceeds K_PAD rows"
    fused = jnp.zeros((K_PAD, h), dtype=jnp.float32)
    fused = fused.at[:vocab].set(word_tab.astype(jnp.float32))
    fused = fused.at[vocab:vocab + max_pos].set(
        pos_tab.astype(jnp.float32) + tt_tab[0].astype(jnp.float32))
    return fused, gamma.reshape(1, h).astype(jnp.float32), \
        beta.reshape(1, h).astype(jnp.float32)


def bert_embeddings_pallas(input_ids, fused_tab, gamma2, beta2):
    """Default path of BertEmbeddings.forward (position_ids / token_type_ids
    from the registered buffers, past_key_values_length == 0).

    input_ids: (B, S) int. Returns (B, S, HIDDEN) float32.
    Note: out-of-range ids (>= vocab) produce a zero word embedding here
    (one-hot row is all zeros) rather than an error as in torch.nn.Embedding.
    """
    b, s = input_ids.shape
    h = fused_tab.shape[1]
    n = b * s
    n_pad = ((n + SUBLANE - 1) // SUBLANE) * SUBLANE   # 26 -> 32

    word_ids = input_ids.astype(jnp.int32).reshape(n, 1)
    if n_pad != n:
        word_ids = jnp.pad(word_ids, ((0, n_pad - n), (0, 0)))  # pad rows -> id 0

    vmem = pl.BlockSpec(memory_space=pltpu.MemorySpace.VMEM)
    out = pl.pallas_call(
        functools.partial(bert_embeddings_kernel, seq_len=s, vocab=VOCAB),
        out_shape=jax.ShapeDtypeStruct((n_pad, h), jnp.float32),
        in_specs=[vmem] * 4,
        out_specs=vmem,
    )(word_ids, fused_tab, gamma2, beta2)

    # (N_pad, H) -> (B, S, H): slice padding, contiguous reshape, no transpose.
    return out[:n].reshape(b, s, h)


def bert_embeddings_ref(input_ids, word_tab, pos_tab, tt_tab, gamma, beta):
    """Pure-JAX reference mirroring BertEmbeddings.forward (eval, defaults)."""
    b, s = input_ids.shape
    position_ids = jnp.broadcast_to(jnp.arange(s, dtype=jnp.int32), (b, s))
    token_type_ids = jnp.zeros((b, s), dtype=jnp.int32)
    e = word_tab[input_ids] + tt_tab[token_type_ids] + pos_tab[position_ids]
    mu = jnp.mean(e, axis=-1, keepdims=True)
    var = jnp.mean((e - mu) ** 2, axis=-1, keepdims=True)
    return (e - mu) / jnp.sqrt(var + LN_EPS) * gamma + beta


if __name__ == "__main__":
    key = jax.random.PRNGKey(0)
    k_ids, k_w, k_p, k_t, k_g, k_b = jax.random.split(key, 6)

    input_ids = jax.random.randint(k_ids, (B, S), 0, VOCAB, dtype=jnp.int32)
    word_tab = jax.random.normal(k_w, (VOCAB, HIDDEN), dtype=jnp.float32) * 0.02
    word_tab = word_tab.at[PAD_TOKEN_ID].set(0.0)   # nn.Embedding padding_idx init
    pos_tab = jax.random.normal(k_p, (MAX_POS, HIDDEN), dtype=jnp.float32) * 0.02
    tt_tab = jax.random.normal(k_t, (TYPE_VOCAB, HIDDEN), dtype=jnp.float32) * 0.02
    gamma = 1.0 + 0.1 * jax.random.normal(k_g, (HIDDEN,), dtype=jnp.float32)
    beta = 0.1 * jax.random.normal(k_b, (HIDDEN,), dtype=jnp.float32)

    # One-time (model-load) parameter prep, hoisted out of the call path.
    fused_tab, gamma2, beta2 = prepare_embedding_params(
        word_tab, pos_tab, tt_tab, gamma, beta)

    y = bert_embeddings_pallas(input_ids, fused_tab, gamma2, beta2)
    y = jax.block_until_ready(y)

    y_ref = bert_embeddings_ref(input_ids, word_tab, pos_tab, tt_tab, gamma, beta)
    assert y.shape == (B, S, HIDDEN)
    assert jnp.allclose(y, y_ref, atol=1e-4, rtol=1e-4), "mismatch vs reference"

    print("KERNEL_OK")
</pallas_src>

<mosaic_0001>
module attributes {stable_mosaic.version = 11 : i64} {
  func.func @bert_embeddings_kernel(%arg0: memref<32x1xi32, #tpu.memory_space<vmem>>, %arg1: memref<128x768xf32, #tpu.memory_space<vmem>>, %arg2: memref<1x768xf32, #tpu.memory_space<vmem>>, %arg3: memref<1x768xf32, #tpu.memory_space<vmem>>, %arg4: memref<32x768xf32, #tpu.memory_space<vmem>>) attributes {dimension_semantics = [], scalar_prefetch = 0 : i64, scratch_operands = 0 : i64, tpu.core_type = #tpu.core_type<tc>} {
    %c0 = arith.constant 0 : index
    %c0_0 = arith.constant 0 : index
    %0 = vector.load %arg0[%c0, %c0_0] : memref<32x1xi32, #tpu.memory_space<vmem>>, vector<32x1xi32>
    %1 = tpu.iota {dimensions = array<i32: 0>} : vector<32x1xi32>
    %c13_i32 = arith.constant 13 : i32
    %c0_i32 = arith.constant 0 : i32
    %2 = arith.cmpi eq, %c13_i32, %c0_i32 : i32
    %c1_i32 = arith.constant 1 : i32
    %3 = arith.select %2, %c1_i32, %c13_i32 : i32
    %4 = vector.broadcast %3 : i32 to vector<32x1xi32>
    %5 = arith.remsi %1, %4 : vector<32x1xi32>
    %c0_i32_1 = arith.constant 0 : i32
    %6 = vector.broadcast %c0_i32_1 : i32 to vector<32x1xi32>
    %7 = arith.cmpi ne, %5, %6 : vector<32x1xi32>
    %c0_i32_2 = arith.constant 0 : i32
    %8 = vector.broadcast %c0_i32_2 : i32 to vector<32x1xi32>
    %9 = arith.cmpi slt, %5, %8 : vector<32x1xi32>
    %c0_i32_3 = arith.constant 0 : i32
    %10 = arith.cmpi slt, %3, %c0_i32_3 : i32
    %11 = vector.broadcast %10 : i1 to vector<32x1xi1>
    %12 = vector.broadcast %11 : vector<32x1xi1> to vector<32x1xi1>
    %13 = arith.xori %9, %12 : vector<32x1xi1>
    %14 = arith.andi %13, %7 : vector<32x1xi1>
    %15 = vector.broadcast %3 : i32 to vector<32x1xi32>
    %16 = arith.addi %5, %15 : vector<32x1xi32>
    %17 = arith.select %14, %16, %5 : vector<32x1xi1>, vector<32x1xi32>
    %c64_i32 = arith.constant 64 : i32
    %18 = vector.broadcast %c64_i32 : i32 to vector<32x1xi32>
    %19 = arith.addi %17, %18 : vector<32x1xi32>
    %20 = tpu.iota {dimensions = array<i32: 1>} : vector<32x128xi32>
    %21 = vector.broadcast %0 : vector<32x1xi32> to vector<32x128xi32>
    %22 = arith.cmpi eq, %20, %21 : vector<32x128xi32>
    %23 = vector.broadcast %19 : vector<32x1xi32> to vector<32x128xi32>
    %24 = arith.cmpi eq, %20, %23 : vector<32x128xi32>
    %25 = arith.ori %22, %24 : vector<32x128xi1>
    %26 = arith.extui %25 : vector<32x128xi1> to vector<32x128xi32>
    %27 = arith.sitofp %26 : vector<32x128xi32> to vector<32x128xf32>
    %c0_4 = arith.constant 0 : index
    %c0_5 = arith.constant 0 : index
    %28 = vector.load %arg1[%c0_4, %c0_5] : memref<128x768xf32, #tpu.memory_space<vmem>>, vector<128x768xf32>
    %cst = arith.constant dense<0.000000e+00> : vector<32x768xf32>
    %29 = tpu.matmul %27, %28, %cst {dimension_numbers = #tpu.dot_dimension_numbers<[1], [0], [0], [1], [0, 0, 1, 1], [], []>} : vector<32x128xf32>, vector<128x768xf32>, vector<32x768xf32> -> vector<32x768xf32>
    %cst_6 = arith.constant dense<0.000000e+00> : vector<32xf32>
    %30 = vector.multi_reduction <add>, %29, %cst_6 [1] : vector<32x768xf32> to vector<32xf32>
    %31 = vector.shape_cast %30 : vector<32xf32> to vector<32x1xf32>
    %cst_7 = arith.constant 7.680000e+02 : f32
    %32 = vector.broadcast %cst_7 : f32 to vector<32x1xf32>
    %33 = arith.divf %31, %32 : vector<32x1xf32>
    %34 = vector.broadcast %33 : vector<32x1xf32> to vector<32x768xf32>
    %35 = arith.subf %29, %34 : vector<32x768xf32>
    %36 = arith.mulf %35, %35 : vector<32x768xf32>
    %cst_8 = arith.constant dense<0.000000e+00> : vector<32xf32>
    %37 = vector.multi_reduction <add>, %36, %cst_8 [1] : vector<32x768xf32> to vector<32xf32>
    %38 = vector.shape_cast %37 : vector<32xf32> to vector<32x1xf32>
    %cst_9 = arith.constant 7.680000e+02 : f32
    %39 = vector.broadcast %cst_9 : f32 to vector<32x1xf32>
    %40 = arith.divf %38, %39 : vector<32x1xf32>
    %cst_10 = arith.constant 9.99999996E-13 : f32
    %41 = vector.broadcast %cst_10 : f32 to vector<32x1xf32>
    %42 = arith.addf %40, %41 : vector<32x1xf32>
    %43 = math.rsqrt %42 : vector<32x1xf32>
    %c0_11 = arith.constant 0 : index
    %c0_12 = arith.constant 0 : index
    %44 = vector.load %arg2[%c0_11, %c0_12] : memref<1x768xf32, #tpu.memory_space<vmem>>, vector<1x768xf32>
    %45 = vector.broadcast %43 : vector<32x1xf32> to vector<32x768xf32>
    %46 = vector.broadcast %44 : vector<1x768xf32> to vector<32x768xf32>
    %47 = arith.mulf %45, %46 : vector<32x768xf32>
    %48 = arith.mulf %35, %47 : vector<32x768xf32>
    %c0_13 = arith.constant 0 : index
    %c0_14 = arith.constant 0 : index
    %49 = vector.load %arg3[%c0_13, %c0_14] : memref<1x768xf32, #tpu.memory_space<vmem>>, vector<1x768xf32>
    %50 = vector.broadcast %49 : vector<1x768xf32> to vector<32x768xf32>
    %51 = arith.addf %48, %50 : vector<32x768xf32>
    %c0_15 = arith.constant 0 : index
    %c0_16 = arith.constant 0 : index
    %52 = vector.load %arg4[%c0_15, %c0_16] : memref<32x768xf32, #tpu.memory_space<vmem>>, vector<32x768xf32>
    tpu.vector_store %arg4[%c0_15, %c0_16], %51 {strides = array<i32>} : memref<32x768xf32, #tpu.memory_space<vmem>>, vector<32x768xf32>,
    return
  }
}

</mosaic_0001>

<bundles_post_ra>
// kernel: tpu_custom_call.1
= control target key start
LH: loop header
LB: loop body
LE: loop exit
PB: predicated region body
PF: predicated region fallthrough
CT: control target
= control target key end

     0   :  { %9 = vsyncpa [#allocation3], 0  ;;  %s1432_s0 = inlined_call_operand.vmem [shape: s32[32,1], index: 0, kind: input, shape index: {}]   ;;  %s1433_s1 = inlined_call_operand.hbm [shape: f32[128,768], index: 1, kind: input, shape index: {}]   ;;  %s1434_s2 = inlined_call_operand.vmem [shape: f32[1,768], index: 2, kind: input, shape index: {}]   ;;  %s1435_s3 = inlined_call_operand.vmem [shape: f32[1,768], index: 3, kind: input, shape index: {}]   ;;  %s1436_s4 = inlined_call_operand.hbm [shape: f32[32,768], index: 4, kind: output, shape index: {}]  }
   0x1   :  { %10 = vsyncpa [#allocation4], 0  ;;  %s1005_s15 = smov [#allocation2]   ;;  %s957_s19 = scalar_lea.hbm %s1433_s1, 12288 }
   0x2   :  { %s18_s16 = sshll.u32 %s1005_s15, 4  ;;  %p958_p0 = scmp.ne.s32.totalorder %s1433_s1, %s957_s19  ;;  %s19_s16 = int_to_ptr.vmem [resolvable:$true] %s18_s16 }
   0x3   :  { %p961_p1 = scmp.lt.u32.totalorder %s957_s19, %s1433_s1 }
   0x5   :  { %p963_p2 = pnand %p961_p1, %p958_p0 }
   0x7   :  { %966 = shalt.err (!%p963_p2)
}
   0x8   :  { %s967_s24 = scalar_lea.vmem %s19_s16, 12288  ;;  %p972_p4 = scmp.lt.s32.totalorder %s19_s16, %s19_s16 }
   0x9   :  { %p968_p3 = scmp.ne.s32.totalorder %s19_s16, %s967_s24  ;;  %p973_p5 = scmp.lt.s32.totalorder %s967_s24, %s967_s24 }
   0xb   :  { %p974_p6 = por %p973_p5, %p972_p4 }
   0xd   :  { %p975_p7 = pnand %p974_p6, %p968_p3 }
   0xf   :  { %978 = shalt.err (!%p975_p7)
}
  0x10   :  { %s1006_s25 = smov 768   ;;  %s1007_s26 = smov 48  }
  0x11   :  { %24 = dma.hbm_to_vmem [thread:$0]  %s1433_s1, 12288, %s19_s16, [#allocation3], %s1006_s25, %s1006_s25, %s1007_s26  }
  0x12   :  { %1001 = dma.done.wait [#allocation3], 12288  }
  0x13   :  { %1002 = vsyncadd [#allocation3], 4294955008  ;;  %v1008_v0 = vmov 0   ;;  %v32_v1 = vld [vmem:[%s1432_s0] sm:$0xff]  ;;  %v33_v2 = vld [vmem:[%s1432_s0 + $0x8] sm:$0xff]  ;;  %v1009_v11 = vmov 0.0  }
  0x14   :  { %947 = vset.pattern.permute.xlu0 %v1008_v0  ;;  %948 = vset.pattern.permute.xlu1 %v1008_v0  ;;  %v34_v3 = vld [vmem:[%s1432_s0 + $0x10] sm:$0xff]  ;;  %v35_v4 = vld [vmem:[%s1432_s0 + $0x18] sm:$0xff]  ;;  %v150_v6 = vld [vmem:[#allocation2 + $0x38] sm:$0xff] }
  0x15   :  { %112 = vperm.xlu0 %947, %v32_v1   ;;  %118 = vperm.xlu1 %948, %v34_v3   ;;  %v144_v5 = vld [vmem:[#allocation2 + $0x8] sm:$0xff]  ;;  %v146_v8 = vld [vmem:[#allocation2 + $0x18] sm:$0xff]  ;;  %v143_v10 = vld [vmem:[#allocation2] sm:$0xff] }
  0x16   :  { %v820_v7 = vpack.c.bf16 %v150_v6, %v144_v5  ;;  %v152_v9 = vld [vmem:[#allocation2 + $0x48] sm:$0xff]  ;;  %303 = vmatprep.mubr.f32.mxu0 %v1009_v11  ;;  %392 = vmatprep.mubr.f32.mxu1 %v1009_v11  ;;  %v149_v13 = vld [vmem:[#allocation2 + $0x30] sm:$0xff]  ;;  %v151_v15 = vld [vmem:[#allocation2 + $0x40] sm:$0xff] }
  0x17   :  { %v852_v12 = vpack.c.bf16 %v152_v9, %v146_v8  ;;  %v145_v14 = vld [vmem:[#allocation2 + $0x10] sm:$0xff]  ;;  %v822_v16 = vpack.c.bf16 %v149_v13, %v143_v10  ;;  %v156_v18 = vld [vmem:[#allocation2 + $0x68] sm:$0xff]  ;;  %v162_v19 = vld [vmem:[#allocation2 + $0x98] sm:$0xff] }
  0x18   :  { %821 = vmatprep.subr.bf16.mxu0 %v820_v7  ;;  %v854_v17 = vpack.c.bf16 %v151_v15, %v145_v14  ;;  %v158_v20 = vld [vmem:[#allocation2 + $0x78] sm:$0xff]  ;;  %v824_v21 = vpack.c.bf16 %v162_v19, %v156_v18  ;;  %v164_v22 = vld [vmem:[#allocation2 + $0xa8] sm:$0xff]  ;;  %v155_v23 = vld [vmem:[#allocation2 + $0x60] sm:$0xff] }
  0x19   :  { %115 = vperm.xlu0 %947, %v33_v2   ;;  %121 = vperm.xlu1 %948, %v35_v4   ;;  %v161_v24 = vld [vmem:[#allocation2 + $0x90] sm:$0xff]  ;;  %v856_v25 = vpack.c.bf16 %v164_v22, %v158_v20  ;;  %v163_v28 = vld [vmem:[#allocation2 + $0xa0] sm:$0xff]  ;;  %v168_v29 = vld [vmem:[#allocation2 + $0xc8] sm:$0xff] }
  0x1a   :  { %853 = vmatprep.subr.bf16.mxu1 %v852_v12  ;;  %823 = vmatpush1.bf16.msra.mxu0 %v822_v16  ;;  %v826_v26 = vpack.c.bf16 %v161_v24, %v155_v23  ;;  %v157_v27 = vld [vmem:[#allocation2 + $0x70] sm:$0xff]  ;;  %v174_v31 = vld [vmem:[#allocation2 + $0xf8] sm:$0xff]  ;;  %v176_v33 = vld [vmem:[#allocation2 + $0x108] sm:$0xff] }
  0x1b   :  { %855 = vmatpush1.bf16.msra.mxu1 %v854_v17  ;;  %825 = vmatprep.subr.bf16.mxu0 %v824_v21  ;;  %v858_v30 = vpack.c.bf16 %v163_v28, %v157_v27  ;;  %v170_v32 = vld [vmem:[#allocation2 + $0xd8] sm:$0xff]  ;;  %v828_v34 = vpack.c.bf16 %v174_v31, %v168_v29  ;;  %v167_v36 = vld [vmem:[#allocation2 + $0xc0] sm:$0xff]  ;;  %v173_v37 = vld [vmem:[#allocation2 + $0xf0] sm:$0xff] }
  0x1c   :  { %857 = vmatprep.subr.bf16.mxu1 %v856_v25  ;;  %v860_v35 = vpack.c.bf16 %v176_v33, %v170_v32  ;;  %v169_v38 = vld [vmem:[#allocation2 + $0xd0] sm:$0xff]  ;;  %v175_v39 = vld [vmem:[#allocation2 + $0x100] sm:$0xff]  ;;  %v180_v40 = vld [vmem:[#allocation2 + $0x128] sm:$0xff]  ;;  %v830_v42 = vpack.c.bf16 %v173_v37, %v167_v36 }
  0x1d   :  { %v186_v41 = vld [vmem:[#allocation2 + $0x158] sm:$0xff]  ;;  %v188_v44 = vld [vmem:[#allocation2 + $0x168] sm:$0xff]  ;;  %v862_v45 = vpack.c.bf16 %v175_v39, %v169_v38  ;;  %v179_v47 = vld [vmem:[#allocation2 + $0x120] sm:$0xff] }
  0x1e   :  { %827 = vmatpush1.bf16.msra.mxu0 %v826_v26  ;;  %v182_v43 = vld [vmem:[#allocation2 + $0x138] sm:$0xff]  ;;  %v832_v46 = vpack.c.bf16 %v186_v41, %v180_v40  ;;  %v185_v48 = vld [vmem:[#allocation2 + $0x150] sm:$0xff]  ;;  %v187_v51 = vld [vmem:[#allocation2 + $0x160] sm:$0xff] }
  0x1f   :  { %859 = vmatpush1.bf16.msra.mxu1 %v858_v30  ;;  %829 = vmatprep.subr.bf16.mxu0 %v828_v34  ;;  %v181_v49 = vld [vmem:[#allocation2 + $0x130] sm:$0xff]  ;;  %v864_v50 = vpack.c.bf16 %v188_v44, %v182_v43  ;;  %v192_v52 = vld [vmem:[#allocation2 + $0x188] sm:$0xff]  ;;  %v198_v53 = vld [vmem:[#allocation2 + $0x1b8] sm:$0xff]  ;;  %v834_v56 = vpack.c.bf16 %v185_v48, %v179_v47 }
  0x20   :  { %861 = vmatprep.subr.bf16.mxu1 %v860_v35  ;;  %v194_v54 = vld [vmem:[#allocation2 + $0x198] sm:$0xff]  ;;  %v200_v55 = vld [vmem:[#allocation2 + $0x1c8] sm:$0xff]  ;;  %v866_v57 = vpack.c.bf16 %v187_v51, %v181_v49  ;;  %v836_v58 = vpack.c.bf16 %v198_v53, %v192_v52  ;;  %v191_v59 = vld [vmem:[#allocation2 + $0x180] sm:$0xff] }
  0x21   :  { %v197_v60 = vld [vmem:[#allocation2 + $0x1b0] sm:$0xff]  ;;  %v868_v62 = vpack.c.bf16 %v200_v55, %v194_v54  ;;  %v199_v63 = vld [vmem:[#allocation2 + $0x1c0] sm:$0xff]  ;;  %v204_v0 = vld [vmem:[#allocation2 + $0x1e8] sm:$0xff] }
  0x22   :  { %831 = vmatpush1.bf16.msra.mxu0 %v830_v42  ;;  %v193_v61 = vld [vmem:[#allocation2 + $0x190] sm:$0xff]  ;;  %v210_v1 = vld [vmem:[#allocation2 + $0x218] sm:$0xff]  ;;  %v212_v3 = vld [vmem:[#allocation2 + $0x228] sm:$0xff]  ;;  %v838_v4 = vpack.c.bf16 %v197_v60, %v191_v59  ;;  %v36_v42 = vlaneseq }
  0x23   :  { %863 = vmatpush1.bf16.msra.mxu1 %v862_v45  ;;  %833 = vmatprep.subr.bf16.mxu0 %v832_v46  ;;  %v206_v2 = vld [vmem:[#allocation2 + $0x1f8] sm:$0xff]  ;;  %v870_v5 = vpack.c.bf16 %v199_v63, %v193_v61  ;;  %v840_v6 = vpack.c.bf16 %v210_v1, %v204_v0  ;;  %v203_v7 = vld [vmem:[#allocation2 + $0x1e0] sm:$0xff]  ;;  %v209_v8 = vld [vmem:[#allocation2 + $0x210] sm:$0xff] }
  0x24   :  { %865 = vmatprep.subr.bf16.mxu1 %v864_v50  ;;  %v205_v9 = vld [vmem:[#allocation2 + $0x1f0] sm:$0xff]  ;;  %v872_v10 = vpack.c.bf16 %v212_v3, %v206_v2  ;;  %v211_v12 = vld [vmem:[#allocation2 + $0x220] sm:$0xff]  ;;  %v216_v13 = vld [vmem:[#allocation2 + $0x248] sm:$0xff]  ;;  %v842_v17 = vpack.c.bf16 %v209_v8, %v203_v7  ;;  %v1066_v43 = vshrl.u32 %v36_v42, 7  ;;  %v1089_v8 = vand.u32 127, %v36_v42 }
  0x25   :  { %v222_v14 = vld [vmem:[#allocation2 + $0x278] sm:$0xff]  ;;  %v224_v16 = vld [vmem:[#allocation2 + $0x288] sm:$0xff]  ;;  %v874_v18 = vpack.c.bf16 %v211_v12, %v205_v9  ;;  %v215_v20 = vld [vmem:[#allocation2 + $0x240] sm:$0xff] }
  0x26   :  { %835 = vmatpush1.bf16.msra.mxu0 %v834_v56  ;;  %v218_v15 = vld [vmem:[#allocation2 + $0x258] sm:$0xff]  ;;  %v844_v19 = vpack.c.bf16 %v222_v14, %v216_v13  ;;  %v221_v21 = vld [vmem:[#allocation2 + $0x270] sm:$0xff]  ;;  %v223_v24 = vld [vmem:[#allocation2 + $0x280] sm:$0xff]  ;;  %v1069_v44 = vmul.u32.u64.low 2643056798, %v1066_v43  ;;  %v1070_v45 = vmul.u32.u64.high 2643056798, %v1066_v43, %v1069_v44  ;;  %v38_v46 = vadd.s32 8, %v1066_v43 }
  0x27   :  { %867 = vmatpush1.bf16.msra.mxu1 %v866_v57  ;;  %837 = vmatprep.subr.bf16.mxu0 %v836_v58  ;;  %v217_v22 = vld [vmem:[#allocation2 + $0x250] sm:$0xff]  ;;  %v876_v23 = vpack.c.bf16 %v224_v16, %v218_v15  ;;  %v228_v25 = vld [vmem:[#allocation2 + $0x2a8] sm:$0xff]  ;;  %v234_v26 = vld [vmem:[#allocation2 + $0x2d8] sm:$0xff]  ;;  %v846_v29 = vpack.c.bf16 %v221_v21, %v215_v20  ;;  %v39_v47 = vadd.s32 16, %v1066_v43  ;;  %v40_v52 = vadd.s32 24, %v1066_v43 }
  0x28   :  { %869 = vmatprep.subr.bf16.mxu1 %v868_v62  ;;  %v230_v27 = vld [vmem:[#allocation2 + $0x2b8] sm:$0xff]  ;;  %v236_v28 = vld [vmem:[#allocation2 + $0x2e8] sm:$0xff]  ;;  %v878_v30 = vpack.c.bf16 %v223_v24, %v217_v22  ;;  %v848_v31 = vpack.c.bf16 %v234_v26, %v228_v25  ;;  %v227_v32 = vld [vmem:[#allocation2 + $0x2a0] sm:$0xff]  ;;  %v1074_v48 = vmul.u32.u64.low 2643056798, %v38_v46  ;;  %v1075_v49 = vmul.u32.u64.high 2643056798, %v38_v46, %v1074_v48 }
  0x29   :  { %v233_v33 = vld [vmem:[#allocation2 + $0x2d0] sm:$0xff]  ;;  %v880_v35 = vpack.c.bf16 %v236_v28, %v230_v27  ;;  %v235_v36 = vld [vmem:[#allocation2 + $0x2e0] sm:$0xff]  ;;  %v148_v37 = vld [vmem:[#allocation2 + $0x28] sm:$0xff]  ;;  %v1077_v50 = vmul.u32.u64.low 2643056798, %v39_v47  ;;  %v1078_v51 = vmul.u32.u64.high 2643056798, %v39_v47, %v1077_v50  ;;  %v47_v53 = vshrl.u32 %v1070_v45, 3 }
  0x2a   :  { %839 = vmatpush1.bf16.msra.mxu0 %v838_v4  ;;  %v229_v34 = vld [vmem:[#allocation2 + $0x2b0] sm:$0xff]  ;;  %v154_v38 = vld [vmem:[#allocation2 + $0x58] sm:$0xff]  ;;  %v850_v39 = vpack.c.bf16 %v233_v33, %v227_v32  ;;  %v1082_v54 = vmul.u32.u64.low 2643056798, %v40_v52  ;;  %v1083_v55 = vmul.u32.u64.high 2643056798, %v40_v52, %v1082_v54  ;;  %v58_v57 = vshrl.u32 %v1075_v49, 3  ;;  %v147_v12 = vld [vmem:[#allocation2 + $0x20] sm:$0xff] }
  0x2b   :  { %871 = vmatpush1.bf16.msra.mxu1 %v870_v5  ;;  %841 = vmatprep.subr.bf16.mxu0 %v840_v6  ;;  %v882_v40 = vpack.c.bf16 %v235_v36, %v229_v34  ;;  %v884_v41 = vpack.c.bf16 %v154_v38, %v148_v37  ;;  %v48_v56 = vmul.u32 13, %v47_v53  ;;  %v69_v58 = vshrl.u32 %v1078_v51, 3  ;;  %v153_v13 = vld [vmem:[#allocation2 + $0x50] sm:$0xff]  ;;  %v159_v22 = vld [vmem:[#allocation2 + $0x80] sm:$0xff]  ;;  %v172_v25 = vld [vmem:[#allocation2 + $0xe8] sm:$0xff] }
  0x2c   :  { %873 = vmatprep.subr.bf16.mxu1 %v872_v10  ;;  %v59_v60 = vmul.u32 13, %v58_v57  ;;  %v80_v62 = vshrl.u32 %v1083_v55, 3  ;;  %v886_v21 = vpack.c.bf16 %v153_v13, %v147_v12  ;;  %v165_v24 = vld [vmem:[#allocation2 + $0xb0] sm:$0xff]  ;;  %v178_v26 = vld [vmem:[#allocation2 + $0x118] sm:$0xff]  ;;  %v196_v48 = vld [vmem:[#allocation2 + $0x1a8] sm:$0xff] }
  0x2d   :  { %v49_v59 = vsub.s32 %v1066_v43, %v48_v56  ;;  %v70_v61 = vmul.u32 13, %v69_v58  ;;  %v890_v33 = vpack.c.bf16 %v165_v24, %v159_v22  ;;  %v892_v34 = vpack.c.bf16 %v178_v26, %v172_v25  ;;  %v177_v36 = vld [vmem:[#allocation2 + $0x110] sm:$0xff]  ;;  %v202_v49 = vld [vmem:[#allocation2 + $0x1d8] sm:$0xff]  ;;  %v195_v53 = vld [vmem:[#allocation2 + $0x1a0] sm:$0xff] }
  0x2e   :  { %843 = vmatpush1.bf16.msra.mxu0 %v842_v17  ;;  %v60_v63 = vsub.s32 %v38_v46, %v59_v60  ;;  %v81_v2 = vmul.u32 13, %v80_v62  ;;  %v160_v17 = vld [vmem:[#allocation2 + $0x88] sm:$0xff]  ;;  %v183_v46 = vld [vmem:[#allocation2 + $0x140] sm:$0xff]  ;;  %v201_v54 = vld [vmem:[#allocation2 + $0x1d0] sm:$0xff] }
  0x2f   :  { %875 = vmatpush1.bf16.msra.mxu1 %v874_v18  ;;  %845 = vmatprep.subr.bf16.mxu0 %v844_v19  ;;  %vm85_vm0 = vcmp.ne.s32.totalorder %v49_v59, 0  ;;  %vm89_vm1 = vcmp.lt.s32.totalorder %v49_v59, 0  ;;  %v97_v0 = vadd.s32 13, %v49_v59  ;;  %v71_v1 = vsub.s32 %v39_v47, %v70_v61  ;;  %v166_v18 = vld [vmem:[#allocation2 + $0xb8] sm:$0xff]  ;;  %v189_v47 = vld [vmem:[#allocation2 + $0x170] sm:$0xff]  ;;  %v208_v55 = vld [vmem:[#allocation2 + $0x208] sm:$0xff] }
  0x30   :  { %877 = vmatprep.subr.bf16.mxu1 %v876_v23  ;;  %vm93_vm2 = vmand %vm89_vm1, %vm85_vm0  ;;  %vm86_vm3 = vcmp.ne.s32.totalorder %v60_v63, 0  ;;  %vm90_vm4 = vcmp.lt.s32.totalorder %v60_v63, 0  ;;  %v98_v3 = vadd.s32 13, %v60_v63  ;;  %v82_v5 = vsub.s32 %v40_v52, %v81_v2  ;;  %v214_v56 = vld [vmem:[#allocation2 + $0x238] sm:$0xff]  ;;  %v213_v60 = vld [vmem:[#allocation2 + $0x230] sm:$0xff] }
  0x31   :  { %v101_v4 = vsel %vm93_vm2, %v97_v0, %v49_v59  ;;  %vm87_vm5 = vcmp.ne.s32.totalorder %v71_v1, 0  ;;  %vm91_vm6 = vcmp.lt.s32.totalorder %v71_v1, 0  ;;  %vm94_vm7 = vmand %vm90_vm4, %vm86_vm3  ;;  %v99_v6 = vadd.s32 13, %v71_v1  ;;  %v207_v59 = vld [vmem:[#allocation2 + $0x200] sm:$0xff]  ;;  %v220_v61 = vld [vmem:[#allocation2 + $0x268] sm:$0xff] }
  0x32   :  { %847 = vmatpush1.bf16.msra.mxu0 %v846_v29  ;;  %v105_v7 = vadd.s32 64, %v101_v4  ;;  %vm1091_vm8 = vmand %vm91_vm6, %vm87_vm5  ;;  %v102_v10 = vsel %vm94_vm7, %v98_v3, %v60_v63  ;;  %vm88_vm9 = vcmp.ne.s32.totalorder %v82_v5, 0  ;;  %vm92_vm10 = vcmp.lt.s32.totalorder %v82_v5, 0  ;;  %v226_v62 = vld [vmem:[#allocation2 + $0x298] sm:$0xff]  ;;  %v225_v2 = vld [vmem:[#allocation2 + $0x290] sm:$0xff] }
  0x33   :  { %879 = vmatpush1.bf16.msra.mxu1 %v878_v30  ;;  %849 = vmatprep.subr.bf16.mxu0 %v848_v31  ;;  %v103_v14 = vsel %vm1091_vm8, %v99_v6, %v71_v1  ;;  %v100_v15 = vadd.s32 13, %v82_v5  ;;  %v106_v16 = vadd.s32 64, %v102_v10  ;;  %vm1098_vm12 = vmand %vm92_vm10, %vm88_vm9  ;;  %v888_v29 = vpack.c.bf16 %v166_v18, %v160_v17  ;;  %v219_v1 = vld [vmem:[#allocation2 + $0x260] sm:$0xff]  ;;  %v232_v3 = vld [vmem:[#allocation2 + $0x2c8] sm:$0xff] }
  0x34   :  { %881 = vmatprep.subr.bf16.mxu1 %v880_v35  ;;  %vm127_vm11 = vcmp.eq.s32.totalorder %v1089_v8, %v105_v7  ;;  %v107_v27 = vadd.s32 64, %v103_v14  ;;  %v1010_v31 = vmov 1.0   ;;  %v171_v35 = vld [vmem:[#allocation2 + $0xe0] sm:$0xff]  ;;  %v898_v50 = vpack.c.bf16 %v189_v47, %v183_v46  ;;  %v238_v4 = vld [vmem:[#allocation2 + $0x2f8] sm:$0xff] }
  0x35   :  { %v104_v30 = vsel %vm1098_vm12, %v100_v15, %v82_v5  ;;  %vm128_vm15 = vcmp.eq.s32.totalorder %v1089_v8, %v106_v16  ;;  %v894_v42 = vpack.c.bf16 %v177_v36, %v171_v35  ;;  %v900_v52 = vpack.c.bf16 %v202_v49, %v196_v48  ;;  %v231_v7 = vld [vmem:[#allocation2 + $0x2c0] sm:$0xff] }
  0x36   :  { %851 = vmatpush1.bf16.msra.mxu0 %v850_v39  ;;  %vm129_vm1 = vcmp.eq.s32.totalorder %v1089_v8, %v107_v27  ;;  %v108_v37 = vadd.s32 64, %v104_v30  ;;  %v184_v39 = vld [vmem:[#allocation2 + $0x148] sm:$0xff]  ;;  %v902_v57 = vpack.c.bf16 %v201_v54, %v195_v53  ;;  %v904_v58 = vpack.c.bf16 %v214_v56, %v208_v55 }
  0x37   :  { %883 = vmatpush1.bf16.msra.mxu1 %v882_v40  ;;  %885 = vmatprep.subr.bf16.mxu0 %v884_v41  ;;  %v190_v40 = vld [vmem:[#allocation2 + $0x178] sm:$0xff]  ;;  %v906_v63 = vpack.c.bf16 %v213_v60, %v207_v59  ;;  %v908_v0 = vpack.c.bf16 %v226_v62, %v220_v61  ;;  %v910_v5 = vpack.c.bf16 %v225_v2, %v219_v1 }
  0x38   :  { %916 = vmatprep.subr.bf16.mxu1 %v884_v41  ;;  %v896_v45 = vpack.c.bf16 %v190_v40, %v184_v39  ;;  %vm130_vm5 = vcmp.eq.s32.totalorder %v1089_v8, %v108_v37  ;;  %v912_v6 = vpack.c.bf16 %v238_v4, %v232_v3 }
  0x94   :  { %v113_v20 = vpop.permute.xlu0 %112  ;;  %v119_v23 = vpop.permute.xlu1 %118 }
  0x95   :  { %vm123_vm13 = vcmp.eq.s32.totalorder %v1089_v8, %v113_v20  ;;  %vm125_vm2 = vcmp.eq.s32.totalorder %v1089_v8, %v119_v23 }
  0x96   :  { %vm1103_vm14 = vmor %vm123_vm13, %vm127_vm11 }
  0x97   :  { %808 = vmatmul.mubr.msk.f32.vlgmr.msra.gmra.mrb[0].mxu0 %vm1103_vm14, %v1010_v31  ;;  %812 = vmatmul.mubr.msk.f32.vlgmr.msra.gmra.mrb[0].mxu1 %vm1103_vm14, %v1010_v31  ;;  %vm1131_vm4 = vmor %vm125_vm2, %vm129_vm1 }
  0x98   :  { %887 = vmatpush1.bf16.msra.mxu0 %v886_v21  ;;  %924 = vmatpush1.bf16.msra.mxu1 %v886_v21  ;;  %v116_v32 = vpop.permute.xlu0 %115  ;;  %v122_v41 = vpop.permute.xlu1 %121 }
  0x99   :  { %vm124_vm0 = vcmp.eq.s32.totalorder %v1089_v8, %v116_v32  ;;  %309 = vmatprep.mubr.f32.mxu0 %v1009_v11  ;;  %398 = vmatprep.mubr.f32.mxu1 %v1009_v11  ;;  %vm126_vm6 = vcmp.eq.s32.totalorder %v1089_v8, %v122_v41  ;;  %v237_v8 = vld [vmem:[#allocation2 + $0x2f0] sm:$0xff] }
  0x9a   :  { %vm1121_vm3 = vmor %vm124_vm0, %vm128_vm15  ;;  %889 = vmatprep.subr.bf16.mxu0 %v888_v29  ;;  %917 = vmatprep.subr.bf16.mxu1 %v888_v29  ;;  %v914_v9 = vpack.c.bf16 %v237_v8, %v231_v7 }
  0x9b   :  { %809 = vmatmul.mubr.msk.f32.gmra.mrb[2].mxu0 %vm1121_vm3, %v1010_v31  ;;  %813 = vmatmul.mubr.msk.f32.gmra.mrb[2].mxu1 %vm1121_vm3, %v1010_v31  ;;  %vm1145_vm7 = vmor %vm126_vm6, %vm130_vm5 }
  0x9c   :  { %891 = vmatpush1.bf16.msra.mxu0 %v890_v33  ;;  %925 = vmatpush1.bf16.msra.mxu1 %v890_v33 }
  0x9d   :  { %893 = vmatprep.subr.bf16.mxu0 %v892_v34  ;;  %918 = vmatprep.subr.bf16.mxu1 %v892_v34 }
  0x9e   :  { %315 = vmatprep.mubr.f32.mxu0 %v1009_v11  ;;  %404 = vmatprep.mubr.f32.mxu1 %v1009_v11 }
  0x9f   :  { %810 = vmatmul.mubr.msk.f32.gmra.mrb[4].mxu0 %vm1131_vm4, %v1010_v31  ;;  %814 = vmatmul.mubr.msk.f32.gmra.mrb[4].mxu1 %vm1131_vm4, %v1010_v31 }
  0xa0   :  { %895 = vmatpush1.bf16.msra.mxu0 %v894_v42  ;;  %926 = vmatpush1.bf16.msra.mxu1 %v894_v42 }
  0xa1   :  { %897 = vmatprep.subr.bf16.mxu0 %v896_v45  ;;  %919 = vmatprep.subr.bf16.mxu1 %v896_v45 }
  0xa2   :  { %321 = vmatprep.mubr.f32.mxu0 %v1009_v11  ;;  %410 = vmatprep.mubr.f32.mxu1 %v1009_v11 }
  0xa3   :  { %811 = vmatmul.mubr.msk.f32.gmra.mrb[6].mxu0 %vm1145_vm7, %v1010_v31  ;;  %815 = vmatmul.mubr.msk.f32.gmra.mrb[6].mxu1 %vm1145_vm7, %v1010_v31 }
  0xa4   :  { %899 = vmatpush1.bf16.msra.mxu0 %v898_v50  ;;  %927 = vmatpush1.bf16.msra.mxu1 %v898_v50 }
  0xa5   :  { %901 = vmatprep.subr.bf16.mxu0 %v900_v52  ;;  %920 = vmatprep.subr.bf16.mxu1 %v900_v52 }
  0xa6   :  { %481 = vmatprep.mubr.f32.mxu0 %v1009_v11  ;;  %493 = vmatprep.mubr.f32.mxu1 %v1009_v11 }
  0xa8   :  { %903 = vmatpush1.bf16.msra.mxu0 %v902_v57  ;;  %928 = vmatpush1.bf16.msra.mxu1 %v902_v57 }
  0xa9   :  { %905 = vmatprep.subr.bf16.mxu0 %v904_v58  ;;  %921 = vmatprep.subr.bf16.mxu1 %v904_v58 }
  0xac   :  { %907 = vmatpush1.bf16.msra.mxu0 %v906_v63  ;;  %929 = vmatpush1.bf16.msra.mxu1 %v906_v63 }
  0xad   :  { %909 = vmatprep.subr.bf16.mxu0 %v908_v0  ;;  %922 = vmatprep.subr.bf16.mxu1 %v908_v0 }
  0xb0   :  { %911 = vmatpush1.bf16.msra.mxu0 %v910_v5  ;;  %930 = vmatpush1.bf16.msra.mxu1 %v910_v5 }
  0xb1   :  { %913 = vmatprep.subr.bf16.mxu0 %v912_v6  ;;  %923 = vmatprep.subr.bf16.mxu1 %v912_v6 }
  0xb4   :  { %915 = vmatpush1.bf16.msra.mxu0 %v914_v9  ;;  %931 = vmatpush1.bf16.msra.mxu1 %v914_v9 }
  0xb7   :  { %816 = vmatmul.mubr.msk.f32.vlgmr.msra.gmra.mrb[8].mxu0 %vm1103_vm14, %v1010_v31  ;;  %818 = vmatmul.mubr.msk.f32.vlgmr.msra.gmra.mrb[8].mxu1 %vm1131_vm4, %v1010_v31 }
  0xb8   :  { %487 = vmatprep.mubr.f32.mxu0 %v1009_v11  ;;  %499 = vmatprep.mubr.f32.mxu1 %v1009_v11 }
  0xbb   :  { %817 = vmatmul.mubr.msk.f32.gmra.mrb[10].mxu0 %vm1121_vm3, %v1010_v31  ;;  %819 = vmatmul.mubr.msk.f32.gmra.mrb[10].mxu1 %vm1145_vm7, %v1010_v31 }
 0x16a   :  { %v305_v10 = vpop.f32.mrb[0].mxu0  ;;  %v394_v12 = vpop.f32.mrb[0].mxu1 }
 0x16b   :  { %v307_v13 = vpop.f32.mrb[1].mxu0  ;;  %v396_v14 = vpop.f32.mrb[1].mxu1 }
 0x16c   :  { %v506_v15 = vadd.f32 %v307_v13, %v305_v10 }
 0x16e   :  { %v507_v16 = vadd.f32 %v506_v15, %v394_v12  ;;  %v1173_v17 = vpop.f32.mrb[2].mxu0  ;;  %v1175_v18 = vpop.f32.mrb[2].mxu1 }
 0x16f   :  { %v1177_v19 = vpop.f32.mrb[3].mxu0  ;;  %v1179_v11 = vpop.f32.mrb[3].mxu1 }
 0x170   :  { %v508_v20 = vadd.f32 %v507_v16, %v396_v14  ;;  %v513_v21 = vadd.f32 %v1177_v19, %v1173_v17 }
 0x172   :  { %v514_v22 = vadd.f32 %v513_v21, %v1175_v18  ;;  %v317_v23 = vpop.f32.mrb[4].mxu0  ;;  %v406_v24 = vpop.f32.mrb[4].mxu1 }
 0x173   :  { %v319_v25 = vpop.f32.mrb[5].mxu0  ;;  %v408_v26 = vpop.f32.mrb[5].mxu1 }
 0x174   :  { %v515_v27 = vadd.f32 %v514_v22, %v1179_v11  ;;  %v520_v28 = vadd.f32 %v319_v25, %v317_v23 }
 0x176   :  { %v1185_v29 = vpop.f32.mrb[6].mxu0  ;;  %v521_v30 = vadd.f32 %v520_v28, %v406_v24  ;;  %v1187_v31 = vpop.f32.mrb[6].mxu1 }
 0x177   :  { %v1189_v32 = vpop.f32.mrb[7].mxu0  ;;  %v1191_v33 = vpop.f32.mrb[7].mxu1 }
 0x178   :  { %v527_v34 = vadd.f32 %v1189_v32, %v1185_v29  ;;  %v522_v35 = vadd.f32 %v521_v30, %v408_v26 }
 0x17a   :  { %v528_v36 = vadd.f32 %v527_v34, %v1187_v31 }
 0x17c   :  { %v529_v37 = vadd.f32 %v528_v36, %v1191_v33 }
 0x18a   :  { %v483_v38 = vpop.f32.mrb[8].mxu0  ;;  %v495_v39 = vpop.f32.mrb[8].mxu1 }
 0x18b   :  { %v509_v40 = vadd.f32 %v508_v20, %v483_v38  ;;  %v523_v41 = vadd.f32 %v522_v35, %v495_v39  ;;  %v485_v42 = vpop.f32.mrb[9].mxu0  ;;  %v497_v44 = vpop.f32.mrb[9].mxu1 }
 0x18d   :  { %v510_v45 = vadd.f32 %v509_v40, %v485_v42  ;;  %v524_v46 = vadd.f32 %v523_v41, %v497_v44 }
 0x18e   :  { %v489_v47 = vpop.f32.mrb[10].mxu0  ;;  %v1197_v48 = vpop.f32.mrb[10].mxu1 }
 0x18f   :  { %v516_v49 = vadd.f32 %v515_v27, %v489_v47  ;;  %v530_v50 = vadd.f32 %v529_v37, %v1197_v48  ;;  %v1200_v51 = vpop.f32.mrb[11].mxu1  ;;  %511 = vadd.xlane.f32.xlu0 %v510_v45  ;;  %v491_v52 = vpop.f32.mrb[11].mxu0 }
 0x191   :  { %v531_v53 = vadd.f32 %v530_v50, %v1200_v51  ;;  %v517_v54 = vadd.f32 %v516_v49, %v491_v52 }
 0x193   :  { %525 = vadd.xlane.f32.xlu0 %v524_v46  ;;  %518 = vadd.xlane.f32.xlu1 %v517_v54 }
 0x197   :  { %532 = vadd.xlane.f32.xlu0 %v531_v53 }
 0x21c   :  { %v512_v55 = vpop.xlane.xlu0 %511 }
 0x21d   :  { %v535_v56 = vmul.f32 0.0013020834, %v512_v55 }
 0x21f   :  { %v1203_v57 = vsub.f32 %v305_v10, %v535_v56  ;;  %v1205_v58 = vsub.f32 %v307_v13, %v535_v56  ;;  %v1207_v59 = vsub.f32 %v394_v12, %v535_v56  ;;  %v1209_v62 = vsub.f32 %v396_v14, %v535_v56 }
 0x220   :  { %v526_v60 = vpop.xlane.xlu0 %525  ;;  %v519_v61 = vpop.xlane.xlu1 %518  ;;  %v1215_v3 = vsub.f32 %v483_v38, %v535_v56  ;;  %v1225_v10 = vsub.f32 %v485_v42, %v535_v56 }
 0x221   :  { %v537_v63 = vmul.f32 0.0013020834, %v526_v60  ;;  %v536_v0 = vmul.f32 0.0013020834, %v519_v61  ;;  %v563_v1 = vmul.f32 %v1203_v57, %v1203_v57  ;;  %v564_v2 = vmul.f32 %v1205_v58, %v1205_v58 }
 0x222   :  { %v565_v4 = vmul.f32 %v1207_v59, %v1207_v59  ;;  %v566_v12 = vmul.f32 %v1209_v62, %v1209_v62  ;;  %v568_v30 = vmul.f32 %v1225_v10, %v1225_v10 }
 0x223   :  { %v587_v5 = vadd.f32 %v564_v2, %v563_v1  ;;  %v1219_v6 = vsub.f32 %v317_v23, %v537_v63  ;;  %v1221_v7 = vsub.f32 %v319_v25, %v537_v63  ;;  %v1223_v8 = vsub.f32 %v406_v24, %v537_v63 }
 0x224   :  { %v533_v9 = vpop.xlane.xlu0 %532  ;;  %v1229_v13 = vsub.f32 %v408_v26, %v537_v63  ;;  %v1232_v14 = vsub.f32 %v1173_v17, %v536_v0  ;;  %v1234_v16 = vsub.f32 %v495_v39, %v537_v63  ;;  %v567_v23 = vmul.f32 %v1215_v3, %v1215_v3 }
 0x225   :  { %v588_v15 = vadd.f32 %v587_v5, %v565_v4  ;;  %v575_v20 = vmul.f32 %v1219_v6, %v1219_v6  ;;  %v576_v21 = vmul.f32 %v1221_v7, %v1221_v7  ;;  %v538_v22 = vmul.f32 0.0013020834, %v533_v9 }
 0x226   :  { %v1242_v24 = vsub.f32 %v497_v44, %v537_v63  ;;  %v577_v25 = vmul.f32 %v1223_v8, %v1223_v8  ;;  %v1247_v27 = vsub.f32 %v1177_v19, %v536_v0  ;;  %v1250_v28 = vsub.f32 %v1175_v18, %v536_v0 }
 0x227   :  { %v589_v17 = vadd.f32 %v588_v15, %v566_v12  ;;  %v601_v26 = vadd.f32 %v576_v21, %v575_v20  ;;  %v578_v34 = vmul.f32 %v1229_v13, %v1229_v13  ;;  %v1257_v35 = vsub.f32 %v1179_v11, %v536_v0 }
 0x228   :  { %v569_v36 = vmul.f32 %v1232_v14, %v1232_v14  ;;  %v579_v19 = vmul.f32 %v1234_v16, %v1234_v16  ;;  %v570_v18 = vmul.f32 %v1247_v27, %v1247_v27  ;;  %v580_v39 = vmul.f32 %v1242_v24, %v1242_v24 }
 0x229   :  { %v590_v37 = vadd.f32 %v589_v17, %v567_v23  ;;  %v602_v38 = vadd.f32 %v601_v26, %v577_v25  ;;  %v1267_v40 = vsub.f32 %v489_v47, %v536_v0  ;;  %v571_v11 = vmul.f32 %v1250_v28, %v1250_v28 }
 0x22a   :  { %v1272_v41 = vsub.f32 %v1185_v29, %v538_v22  ;;  %v594_v45 = vadd.f32 %v570_v18, %v569_v36  ;;  %v1275_v46 = vsub.f32 %v1189_v32, %v538_v22  ;;  %v1277_v49 = vsub.f32 %v491_v52, %v536_v0  ;;  %v627_v18 = vld [vmem:[%s1434_s2] sm:$0x3f]  ;;  %s1011_s2 = smov [#allocation5]  }
 0x22b   :  { %v591_v42 = vadd.f32 %v590_v37, %v568_v30  ;;  %v603_v44 = vadd.f32 %v602_v38, %v578_v34  ;;  %v572_v50 = vmul.f32 %v1257_v35, %v1257_v35  ;;  %v1282_v47 = vsub.f32 %v1187_v31, %v538_v22 }
 0x22c   :  { %v1285_v53 = vsub.f32 %v1191_v33, %v538_v22  ;;  %v595_v54 = vadd.f32 %v594_v45, %v571_v11  ;;  %v581_v55 = vmul.f32 %v1272_v41, %v1272_v41  ;;  %v582_v32 = vmul.f32 %v1275_v46, %v1275_v46  ;;  %v707_v11 = vld [vmem:[%s1435_s3] sm:$0x3f]  ;;  %s792_s3 = sshll.u32 %s1011_s2, 4  ;;  %s793_s3 = int_to_ptr.vmem [resolvable:$true] %s792_s3 }
 0x22d   :  { %592 = vadd.xlane.f32.xlu1 %v591_v42  ;;  %v604_v29 = vadd.f32 %v603_v44, %v579_v19  ;;  %v573_v52 = vmul.f32 %v1267_v40, %v1267_v40  ;;  %v1294_v56 = vsub.f32 %v1197_v48, %v538_v22  ;;  %v583_v33 = vmul.f32 %v1282_v47, %v1282_v47  ;;  %s979_s13 = scalar_lea.vmem %s793_s3, 3072  ;;  %p984_p9 = scmp.lt.s32.totalorder %s793_s3, %s793_s3 }
 0x22e   :  { %v596_v60 = vadd.f32 %v595_v54, %v572_v50  ;;  %v608_v61 = vadd.f32 %v582_v32, %v581_v55  ;;  %v574_v63 = vmul.f32 %v1277_v49, %v1277_v49  ;;  %v1301_v1 = vsub.f32 %v1200_v51, %v538_v22  ;;  %p980_p8 = scmp.ne.s32.totalorder %s793_s3, %s979_s13  ;;  %p985_p10 = scmp.lt.s32.totalorder %s979_s13, %s979_s13 }
 0x22f   :  { %v605_v31 = vadd.f32 %v604_v29, %v580_v39  ;;  %v584_v2 = vmul.f32 %v1285_v53, %v1285_v53  ;;  %v585_v5 = vmul.f32 %v1294_v56, %v1294_v56  ;;  %v631_v26 = vsub.s32 0, %v1066_v43 }
 0x230   :  { %v597_v0 = vadd.f32 %v596_v60, %v573_v52  ;;  %v609_v4 = vadd.f32 %v608_v61, %v583_v33  ;;  %v586_v12 = vmul.f32 %v1301_v1, %v1301_v1  ;;  %v635_v30 = vsub.s32 1, %v1066_v43  ;;  %p986_p11 = por %p985_p10, %p984_p9 }
 0x231   :  { %606 = vadd.xlane.f32.xlu1 %v605_v31  ;;  %v639_v34 = vsub.s32 2, %v1066_v43  ;;  %v643_v36 = vsub.s32 3, %v1066_v43  ;;  %v647_v19 = vsub.s32 4, %v1066_v43  ;;  %v651_v38 = vsub.s32 5, %v1066_v43 }
 0x232   :  { %v598_v48 = vadd.f32 %v597_v0, %v574_v63  ;;  %v610_v9 = vadd.f32 %v609_v4, %v584_v2  ;;  %v1321_v44 = vrot.slane %v627_v18, %v631_v26  ;;  %v1323_v45 = vrot.slane %v627_v18, %v635_v30  ;;  %p987_p12 = pnand %p986_p11, %p980_p8 }
 0x233   :  { %v1325_v50 = vrot.slane %v627_v18, %v639_v34  ;;  %v1327_v29 = vrot.slane %v627_v18, %v643_v36  ;;  %v1329_v54 = vrot.slane %v627_v18, %v647_v19  ;;  %v1331_v55 = vrot.slane %v627_v18, %v651_v38 }
 0x234   :  { %599 = vadd.xlane.f32.xlu0 %v598_v48  ;;  %v611_v15 = vadd.f32 %v610_v9, %v585_v5  ;;  %v1333_v52 = vrot.slane %v707_v11, %v631_v26  ;;  %v1335_v31 = vrot.slane %v707_v11, %v635_v30  ;;  %v1337_v33 = vrot.slane %v707_v11, %v639_v34 }
 0x235   :  { %v1339_v61 = vrot.slane %v707_v11, %v643_v36  ;;  %v1341_v63 = vrot.slane %v707_v11, %v647_v19  ;;  %v1347_v9 = vrot.slane %v707_v11, %v651_v38 }
 0x236   :  { %v612_v20 = vadd.f32 %v611_v15, %v586_v12 }
 0x238   :  { %613 = vadd.xlane.f32.xlu0 %v612_v20 }
 0x2ba   :  { %v593_v21 = vpop.xlane.xlu1 %592 }
 0x2bb   :  { %v615_v23 = vmul.f32 0.0013020834, %v593_v21 }
 0x2bd   :  { %v619_v51 = vadd.f32 1e-12, %v615_v23 }
 0x2be   :  { %v607_v22 = vpop.xlane.xlu1 %606 }
 0x2bf   :  { %949 = vrsqrt.f32 %v619_v51  ;;  %v617_v25 = vmul.f32 0.0013020834, %v607_v22 }
 0x2c1   :  { %v621_v17 = vadd.f32 1e-12, %v617_v25  ;;  %v600_v37 = vpop.xlane.xlu0 %599 }
 0x2c2   :  { %v616_v39 = vmul.f32 0.0013020834, %v600_v37 }
 0x2c3   :  { %951 = vrsqrt.f32 %v621_v17 }
 0x2c4   :  { %v620_v42 = vadd.f32 1e-12, %v616_v39 }
 0x2c5   :  { %v614_v43 = vpop.xlane.xlu0 %613 }
 0x2c6   :  { %953 = vrsqrt.f32 %v620_v42  ;;  %v618_v32 = vmul.f32 0.0013020834, %v614_v43 }
 0x2c8   :  { %v622_v0 = vadd.f32 1e-12, %v618_v32 }
 0x2c9   :  { %v950_v60 = vpop.eup %949 }
 0x2ca   :  { %v659_v2 = vmul.f32 %v950_v60, %v1321_v44  ;;  %v660_v4 = vmul.f32 %v950_v60, %v1323_v45  ;;  %v661_v48 = vmul.f32 %v950_v60, %v1325_v50  ;;  %v662_v5 = vmul.f32 %v950_v60, %v1327_v29 }
 0x2cb   :  { %v663_v12 = vmul.f32 %v950_v60, %v1329_v54  ;;  %v664_v15 = vmul.f32 %v950_v60, %v1331_v55  ;;  %955 = vrsqrt.f32 %v622_v0 }
 0x2cc   :  { %v683_v20 = vmul.f32 %v659_v2, %v1203_v57  ;;  %v684_v21 = vmul.f32 %v660_v4, %v1205_v58  ;;  %v685_v23 = vmul.f32 %v661_v48, %v1207_v59  ;;  %v686_v51 = vmul.f32 %v662_v5, %v1209_v62 }
 0x2cd   :  { %v952_v22 = vpop.eup %951  ;;  %v687_v25 = vmul.f32 %v663_v12, %v1215_v3  ;;  %v688_v17 = vmul.f32 %v664_v15, %v1225_v10 }
 0x2ce   :  { %v739_v26 = vadd.f32 %v1333_v52, %v683_v20  ;;  %v740_v30 = vadd.f32 %v1335_v31, %v684_v21  ;;  %v741_v34 = vadd.f32 %v1337_v33, %v685_v23  ;;  %v742_v36 = vadd.f32 %v1339_v61, %v686_v51 }
 0x2cf   :  { %v743_v57 = vadd.f32 %v1341_v63, %v687_v25  ;;  %v744_v58 = vadd.f32 %v1347_v9, %v688_v17  ;;  %v671_v59 = vmul.f32 %v952_v22, %v1321_v44  ;;  %v672_v62 = vmul.f32 %v952_v22, %v1323_v45 }
 0x2d0   :  { %763 = vst [vmem:[#allocation5] sm:$0xff] %v739_v26  ;;  %764 = vst [vmem:[#allocation5 + $0x8] sm:$0xff] %v740_v30  ;;  %v673_v3 = vmul.f32 %v952_v22, %v1325_v50  ;;  %v674_v10 = vmul.f32 %v952_v22, %v1327_v29  ;;  %v954_v37 = vpop.eup %953  ;;  %v675_v19 = vmul.f32 %v952_v22, %v1329_v54 }
 0x2d1   :  { %765 = vst [vmem:[#allocation5 + $0x10] sm:$0xff] %v741_v34  ;;  %766 = vst [vmem:[#allocation5 + $0x18] sm:$0xff] %v742_v36  ;;  %v676_v38 = vmul.f32 %v952_v22, %v1331_v55  ;;  %v695_v18 = vmul.f32 %v671_v59, %v1219_v6  ;;  %v696_v39 = vmul.f32 %v672_v62, %v1221_v7 }
 0x2d2   :  { %767 = vst [vmem:[#allocation5 + $0x20] sm:$0xff] %v743_v57  ;;  %768 = vst [vmem:[#allocation5 + $0x28] sm:$0xff] %v744_v58  ;;  %v665_v11 = vmul.f32 %v954_v37, %v1321_v44  ;;  %v666_v42 = vmul.f32 %v954_v37, %v1323_v45  ;;  %v667_v43 = vmul.f32 %v954_v37, %v1325_v50 }
 0x2d3   :  { %v668_v32 = vmul.f32 %v954_v37, %v1327_v29  ;;  %v669_v60 = vmul.f32 %v954_v37, %v1329_v54  ;;  %v670_v0 = vmul.f32 %v954_v37, %v1331_v55  ;;  %v697_v2 = vmul.f32 %v673_v3, %v1223_v8 }
 0x2d4   :  { %v698_v4 = vmul.f32 %v674_v10, %v1229_v13  ;;  %v689_v6 = vmul.f32 %v665_v11, %v1232_v14  ;;  %v690_v7 = vmul.f32 %v666_v42, %v1247_v27  ;;  %v691_v48 = vmul.f32 %v667_v43, %v1250_v28 }
 0x2d5   :  { %v692_v5 = vmul.f32 %v668_v32, %v1257_v35  ;;  %v956_v12 = vpop.eup %955  ;;  %v693_v15 = vmul.f32 %v669_v60, %v1267_v40  ;;  %v694_v20 = vmul.f32 %v670_v0, %v1277_v49  ;;  %v699_v21 = vmul.f32 %v675_v19, %v1234_v16 }
 0x2d6   :  { %v700_v23 = vmul.f32 %v676_v38, %v1242_v24  ;;  %v745_v8 = vadd.f32 %v1333_v52, %v689_v6  ;;  %v746_v13 = vadd.f32 %v1335_v31, %v690_v7  ;;  %v747_v14 = vadd.f32 %v1337_v33, %v691_v48 }
 0x2d7   :  { %v748_v27 = vadd.f32 %v1339_v61, %v692_v5  ;;  %v749_v28 = vadd.f32 %v1341_v63, %v693_v15  ;;  %v750_v35 = vadd.f32 %v1347_v9, %v694_v20  ;;  %v751_v40 = vadd.f32 %v1333_v52, %v695_v18 }
 0x2d8   :  { %v752_v49 = vadd.f32 %v1335_v31, %v696_v39  ;;  %769 = vst [vmem:[#allocation5 + $0x30] sm:$0xff] %v745_v8  ;;  %770 = vst [vmem:[#allocation5 + $0x38] sm:$0xff] %v746_v13  ;;  %v753_v16 = vadd.f32 %v1337_v33, %v697_v2  ;;  %v754_v24 = vadd.f32 %v1339_v61, %v698_v4 }
 0x2d9   :  { %771 = vst [vmem:[#allocation5 + $0x40] sm:$0xff] %v747_v14  ;;  %772 = vst [vmem:[#allocation5 + $0x48] sm:$0xff] %v748_v27  ;;  %v755_v51 = vadd.f32 %v1341_v63, %v699_v21  ;;  %v756_v22 = vadd.f32 %v1347_v9, %v700_v23  ;;  %v677_v25 = vmul.f32 %v956_v12, %v1321_v44 }
 0x2da   :  { %773 = vst [vmem:[#allocation5 + $0x50] sm:$0xff] %v749_v28  ;;  %774 = vst [vmem:[#allocation5 + $0x58] sm:$0xff] %v750_v35  ;;  %v678_v17 = vmul.f32 %v956_v12, %v1323_v45  ;;  %v679_v26 = vmul.f32 %v956_v12, %v1325_v50  ;;  %v680_v30 = vmul.f32 %v956_v12, %v1327_v29 }
 0x2db   :  { %775 = vst [vmem:[#allocation5 + $0x60] sm:$0xff] %v751_v40  ;;  %776 = vst [vmem:[#allocation5 + $0x68] sm:$0xff] %v752_v49  ;;  %v681_v34 = vmul.f32 %v956_v12, %v1329_v54  ;;  %v682_v36 = vmul.f32 %v956_v12, %v1331_v55  ;;  %v701_v57 = vmul.f32 %v677_v25, %v1272_v41 }
 0x2dc   :  { %777 = vst [vmem:[#allocation5 + $0x70] sm:$0xff] %v753_v16  ;;  %778 = vst [vmem:[#allocation5 + $0x78] sm:$0xff] %v754_v24  ;;  %v702_v58 = vmul.f32 %v678_v17, %v1275_v46  ;;  %v703_v44 = vmul.f32 %v679_v26, %v1282_v47  ;;  %v704_v45 = vmul.f32 %v680_v30, %v1285_v53 }
 0x2dd   :  { %779 = vst [vmem:[#allocation5 + $0x80] sm:$0xff] %v755_v51  ;;  %780 = vst [vmem:[#allocation5 + $0x88] sm:$0xff] %v756_v22  ;;  %v705_v50 = vmul.f32 %v681_v34, %v1294_v56  ;;  %v706_v29 = vmul.f32 %v682_v36, %v1301_v1  ;;  %v757_v59 = vadd.f32 %v1333_v52, %v701_v57 }
 0x2de   :  { %v758_v54 = vadd.f32 %v1335_v31, %v702_v58  ;;  %v759_v55 = vadd.f32 %v1337_v33, %v703_v44  ;;  %v760_v41 = vadd.f32 %v1339_v61, %v704_v45 }
 0x2df   :  { %v761_v46 = vadd.f32 %v1341_v63, %v705_v50  ;;  %v762_v47 = vadd.f32 %v1347_v9, %v706_v29  ;;  %781 = vst [vmem:[#allocation5 + $0x90] sm:$0xff] %v757_v59 }
 0x2e0   :  { %782 = vst [vmem:[#allocation5 + $0x98] sm:$0xff] %v758_v54  ;;  %783 = vst [vmem:[#allocation5 + $0xa0] sm:$0xff] %v759_v55 }
 0x2e1   :  { %784 = vst [vmem:[#allocation5 + $0xa8] sm:$0xff] %v760_v41  ;;  %785 = vst [vmem:[#allocation5 + $0xb0] sm:$0xff] %v761_v46 }
 0x2e2   :  { %786 = vst [vmem:[#allocation5 + $0xb8] sm:$0xff] %v762_v47 }
 0x2e3   :  { %990 = shalt.err (!%p987_p12)
}
 0x2e4   :  { %s991_s16 = scalar_lea.hbm %s1436_s4, 3072 }
 0x2e5   :  { %p992_p13 = scmp.ne.s32.totalorder %s1436_s4, %s991_s16  ;;  %p995_p0 = scmp.lt.u32.totalorder %s991_s16, %s1436_s4 }
 0x2e7   :  { %p997_p1 = pnand %p995_p0, %p992_p13 }
 0x2e9   :  { %1000 = shalt.err (!%p997_p1)
}
 0x2ea   :  { %798 = dma.vmem_to_hbm [thread:$0]  %s793_s3, 3072, %s1436_s4, [#allocation4], %s1006_s25, %s1006_s25, %s1007_s26  }
 0x2eb   :  { %1003 = dma.done.wait [#allocation4], 3072  }
 0x2ec   :  { %1004 = vsyncadd [#allocation4], 4294964224 }
 0x2ed   :  { %802 = vsyncpa [#allocation3], 1 }
 0x2ee   :  { %803 = vsyncpa [#allocation4], 1 }

</bundles_post_ra>
